<compile_context>
chip_gen: v6e
topology: v6e:2x2x1
jax: 0.10.0
libtpu: 0.0.40
codegen_flags: <defaults>
</compile_context>

<pallas_src>
import functools

import jax
import jax.numpy as jnp
from jax.experimental import pallas as pl
from jax.experimental.pallas import tpu as pltpu


# ----------------------------------------------------------------------------
# Kernel: the whole BasicBlock for one image, fully VMEM-resident.
# ----------------------------------------------------------------------------
def basic_block_kernel(x_ref, w1_ref, s1_ref, b1_ref, w2_ref, s2_ref, b2_ref,
                       o_ref, xpad_ref, *, H, W, C):
    """Fused BasicBlock for one image in lane-dense (H, W*C) layout.

    x_ref   : (1, H, W*C)     input image (f32); also the residual
    w*_ref  : (3, W*C, W*C)   banded conv weights (compute dtype)
    s*_ref  : (1, W*C)        folded BN scale (f32), per-channel tiled over W
    b*_ref  : (1, W*C)        folded BN bias  (f32), per-channel tiled over W
    o_ref   : (1, H, W*C)     output image
    xpad_ref: (H+2, W*C)      VMEM scratch, H-padded activations (f32)
    """
    WC = W * C
    cdt = w1_ref.dtype                      # matmul operand dtype (bf16 / f32)
    f32 = jnp.float32

    # Zero the 1-row halo at top/bottom.  (W-padding is folded into the banded
    # weights, so no padding is needed along the lane axis.)
    zero_row = jnp.zeros((1, WC), xpad_ref.dtype)
    xpad_ref[0:1, :] = zero_row
    xpad_ref[H + 1:H + 2, :] = zero_row

    x = x_ref[0].astype(f32)                # (H, WC) residual, kept in vregs

    def conv3x3(w_ref):
        # One MXU matmul per kernel row; K = W*Cin, f32 accumulation.
        acc = jnp.dot(xpad_ref[0:H, :].astype(cdt), w_ref[0],
                      preferred_element_type=f32)
        acc = acc + jnp.dot(xpad_ref[1:H + 1, :].astype(cdt), w_ref[1],
                            preferred_element_type=f32)
        acc = acc + jnp.dot(xpad_ref[2:H + 2, :].astype(cdt), w_ref[2],
                            preferred_element_type=f32)
        return acc                          # (H, WC) f32

    # conv1 -> BN1 -> ReLU   (f32 epilogue)
    xpad_ref[1:H + 1, :] = x
    y1 = jnp.maximum(conv3x3(w1_ref) * s1_ref[...] + b1_ref[...], 0.0)

    # conv2 -> BN2 -> +residual -> ReLU ; intermediate never leaves VMEM.
    xpad_ref[1:H + 1, :] = y1
    y2 = conv3x3(w2_ref) * s2_ref[...] + b2_ref[...] + x
    o_ref[0] = jnp.maximum(y2, 0.0).astype(o_ref.dtype)


# ----------------------------------------------------------------------------
# Wrapper
# ----------------------------------------------------------------------------
def _make_band_weight(w_hwio, Wdim, dtype):
    """(3,3,Cin,Cout) HWIO -> (3, Wdim*Cin, Wdim*Cout) banded matrices.

    band[ky, wi*Cin+ci, wo*Cout+co] = w[ky, wi-wo+1, ci, co] if 0 <= wi-wo+1 < 3
    so (H, Wdim*Cin) @ band[ky] applies all kx taps (and the zero padding
    along W) of kernel row ky in a single lane-dense matmul.
    """
    KH, KW, Cin, Cout = w_hwio.shape
    wi = jnp.arange(Wdim)[:, None]
    wo = jnp.arange(Wdim)[None, :]
    kx = wi - wo + (KW // 2)                              # (Wdim, Wdim)
    valid = (kx >= 0) & (kx < KW)
    g = w_hwio[:, jnp.clip(kx, 0, KW - 1)]                # (KH, Wi, Wo, Cin, Cout)
    g = jnp.where(valid[None, :, :, None, None], g, 0.0)
    g = jnp.transpose(g, (0, 1, 3, 2, 4))                 # (KH, Wi, Cin, Wo, Cout)
    return g.reshape(KH, Wdim * Cin, Wdim * Cout).astype(dtype)


def basic_block_forward(x_nchw, params, *, compute_dtype=jnp.bfloat16):
    """BasicBlock forward. x_nchw: (N, C, H, W) -> (N, C, H, W)."""
    N, C, H, W = x_nchw.shape
    WC = W * C

    # NCHW -> lane-dense (N, H, W*C).  In an NHWC-resident network this
    # transpose disappears; it is kept only to match the PyTorch interface.
    x2d = jnp.transpose(x_nchw, (0, 2, 3, 1)).reshape(N, H, WC)

    w1b = _make_band_weight(params["w1"], W, compute_dtype)
    w2b = _make_band_weight(params["w2"], W, compute_dtype)

    def tile_c(v):  # per-channel (C,) -> (1, W*C) lane vector matching w*C + c
        return jnp.tile(v.astype(jnp.float32), W).reshape(1, WC)

    s1, b1 = tile_c(params["scale1"]), tile_c(params["bias1"])
    s2, b2 = tile_c(params["scale2"]), tile_c(params["bias2"])

    def full_spec(shape):   # whole (small) array resident in VMEM every step
        return pl.BlockSpec(shape, lambda n: (0,) * len(shape))

    out2d = pl.pallas_call(
        functools.partial(basic_block_kernel, H=H, W=W, C=C),
        out_shape=jax.ShapeDtypeStruct((N, H, WC), x_nchw.dtype),
        grid=(N,),
        in_specs=[
            pl.BlockSpec((1, H, WC), lambda n: (n, 0, 0)),   # x (and residual)
            full_spec(w1b.shape), full_spec(s1.shape), full_spec(b1.shape),
            full_spec(w2b.shape), full_spec(s2.shape), full_spec(b2.shape),
        ],
        out_specs=pl.BlockSpec((1, H, WC), lambda n: (n, 0, 0)),
        scratch_shapes=[pltpu.VMEM((H + 2, WC), jnp.float32)],
        compiler_params=pltpu.CompilerParams(
            dimension_semantics=("parallel",)),   # shard batch over v7x cores
    )(x2d, w1b, s1, b1, w2b, s2, b2)

    return jnp.transpose(out2d.reshape(N, H, W, C), (0, 3, 1, 2))


# ----------------------------------------------------------------------------
# Deterministic synthetic parameters (inference-folded BN)
# ----------------------------------------------------------------------------
def init_params(key, inplanes, planes):
    k1, k2 = jax.random.split(key)
    w1 = 0.1 * jax.random.normal(k1, (3, 3, inplanes, planes), jnp.float32)
    w2 = 0.1 * jax.random.normal(k2, (3, 3, planes, planes), jnp.float32)

    eps = 1e-5
    c = jnp.arange(planes, dtype=jnp.float32)
    gamma1, beta1 = 1.0 + 0.10 * c, 0.05 * c
    mean1, var1 = 0.02 * c, 1.0 + 0.10 * c
    gamma2, beta2 = 1.0 - 0.05 * c, -0.03 * c
    mean2, var2 = -0.01 * c, 1.0 + 0.20 * c

    scale1 = gamma1 / jnp.sqrt(var1 + eps)
    bias1 = beta1 - mean1 * scale1
    scale2 = gamma2 / jnp.sqrt(var2 + eps)
    bias2 = beta2 - mean2 * scale2
    return dict(w1=w1, w2=w2, scale1=scale1, bias1=bias1,
                scale2=scale2, bias2=bias2)


# ----------------------------------------------------------------------------
# Pure-JAX reference with the SAME mixed-precision policy as the kernel
# (bf16 matmul operands, f32 accumulation, f32 BN/residual/ReLU epilogue).
# ----------------------------------------------------------------------------
def ref_forward(x_nchw, p, *, compute_dtype=jnp.bfloat16):
    x = jnp.transpose(x_nchw, (0, 2, 3, 1)).astype(jnp.float32)   # NHWC
    dn = ("NHWC", "HWIO", "NHWC")

    def conv(a, w):
        return jax.lax.conv_general_dilated(
            a.astype(compute_dtype), w.astype(compute_dtype), (1, 1), "SAME",
            dimension_numbers=dn, preferred_element_type=jnp.float32)

    out = conv(x, p["w1"]) * p["scale1"] + p["bias1"]
    out = jnp.maximum(out, 0.0)
    out = conv(out, p["w2"]) * p["scale2"] + p["bias2"]
    out = jnp.maximum(out + x, 0.0)
    return jnp.transpose(out, (0, 3, 1, 2))


# ----------------------------------------------------------------------------
if __name__ == "__main__":
    key = jax.random.PRNGKey(0)
    kx, kp = jax.random.split(key)

    N, C, H, W = 2, 4, 16, 16      # inplanes == planes, stride=1, no downsample
    x = jax.random.normal(kx, (N, C, H, W), jnp.float32)
    params = init_params(kp, C, C)

    fwd = jax.jit(basic_block_forward)           # bf16 MXU path (default)
    out = jax.block_until_ready(fwd(x, params))
    assert out.shape == (N, C, H, W)

    ref = ref_forward(x, params)                 # same mixed-precision policy
    # Typical |diff| is ~1e-6 (f32 accumulation-order only); the tolerance
    # leaves headroom for bf16 re-quantization of the intermediate activation
    # between two legitimate mixed-precision implementations.
    assert jnp.allclose(out, ref, atol=1e-2, rtol=1e-2), (
        "mismatch vs reference", float(jnp.max(jnp.abs(out - ref))))

    print("KERNEL_OK")
</pallas_src>

<mosaic_0001>
module attributes {stable_mosaic.version = 11 : i64} {
  func.func @basic_block_kernel(%arg0: i32, %arg1: memref<1x16x64xf32, #tpu.memory_space<vmem>>, %arg2: memref<3x64x64xbf16, #tpu.memory_space<vmem>>, %arg3: memref<1x64xf32, #tpu.memory_space<vmem>>, %arg4: memref<1x64xf32, #tpu.memory_space<vmem>>, %arg5: memref<3x64x64xbf16, #tpu.memory_space<vmem>>, %arg6: memref<1x64xf32, #tpu.memory_space<vmem>>, %arg7: memref<1x64xf32, #tpu.memory_space<vmem>>, %arg8: memref<1x16x64xf32, #tpu.memory_space<vmem>>, %arg9: memref<18x64xf32, #tpu.memory_space<vmem>>) attributes {dimension_semantics = [#tpu.dimension_semantics<parallel>], iteration_bounds = array<i64: 2>, scalar_prefetch = 0 : i64, scratch_operands = 1 : i64, tpu.core_type = #tpu.core_type<tc>, window_params = [{transform_indices = @transform_0, window_bounds = array<i64: 1, 16, 64>}, {pipeline_mode = #tpu.pipeline_mode<synchronous>, transform_indices = @transform_1, window_bounds = array<i64: 3, 64, 64>}, {pipeline_mode = #tpu.pipeline_mode<synchronous>, transform_indices = @transform_2, window_bounds = array<i64: 1, 64>}, {pipeline_mode = #tpu.pipeline_mode<synchronous>, transform_indices = @transform_3, window_bounds = array<i64: 1, 64>}, {pipeline_mode = #tpu.pipeline_mode<synchronous>, transform_indices = @transform_4, window_bounds = array<i64: 3, 64, 64>}, {pipeline_mode = #tpu.pipeline_mode<synchronous>, transform_indices = @transform_5, window_bounds = array<i64: 1, 64>}, {pipeline_mode = #tpu.pipeline_mode<synchronous>, transform_indices = @transform_6, window_bounds = array<i64: 1, 64>}, {transform_indices = @transform_7, window_bounds = array<i64: 1, 16, 64>}]} {
    %cst = arith.constant 0.000000e+00 : f32
    %0 = vector.broadcast %cst : f32 to vector<1x64xf32>
    %c0 = arith.constant 0 : index
    %c0_0 = arith.constant 0 : index
    %1 = vector.load %arg9[%c0, %c0_0] : memref<18x64xf32, #tpu.memory_space<vmem>>, vector<1x64xf32>
    tpu.vector_store %arg9[%c0, %c0_0], %0 {strides = array<i32>} : memref<18x64xf32, #tpu.memory_space<vmem>>, vector<1x64xf32>,
    %c17 = arith.constant 17 : index
    %c0_1 = arith.constant 0 : index
    %2 = vector.load %arg9[%c17, %c0_1] : memref<18x64xf32, #tpu.memory_space<vmem>>, vector<1x64xf32>
    tpu.vector_store %arg9[%c17, %c0_1], %0 {strides = array<i32>} : memref<18x64xf32, #tpu.memory_space<vmem>>, vector<1x64xf32>,
    %c0_2 = arith.constant 0 : index
    %c0_3 = arith.constant 0 : index
    %c0_4 = arith.constant 0 : index
    %3 = vector.load %arg1[%c0_2, %c0_3, %c0_4] : memref<1x16x64xf32, #tpu.memory_space<vmem>>, vector<1x16x64xf32>
    %4 = vector.shape_cast %3 : vector<1x16x64xf32> to vector<16x64xf32>
    %c1 = arith.constant 1 : index
    %c0_5 = arith.constant 0 : index
    %5 = vector.load %arg9[%c1, %c0_5] : memref<18x64xf32, #tpu.memory_space<vmem>>, vector<16x64xf32>
    tpu.vector_store %arg9[%c1, %c0_5], %4 {strides = array<i32>} : memref<18x64xf32, #tpu.memory_space<vmem>>, vector<16x64xf32>,
    %c0_6 = arith.constant 0 : index
    %c0_7 = arith.constant 0 : index
    %6 = vector.load %arg9[%c0_6, %c0_7] : memref<18x64xf32, #tpu.memory_space<vmem>>, vector<16x64xf32>
    %7 = arith.truncf %6 : vector<16x64xf32> to vector<16x64xbf16>
    %c0_8 = arith.constant 0 : index
    %c0_9 = arith.constant 0 : index
    %c0_10 = arith.constant 0 : index
    %8 = vector.load %arg2[%c0_8, %c0_9, %c0_10] : memref<3x64x64xbf16, #tpu.memory_space<vmem>>, vector<1x64x64xbf16>
    %9 = vector.shape_cast %8 : vector<1x64x64xbf16> to vector<64x64xbf16>
    %cst_11 = arith.constant dense<0.000000e+00> : vector<16x64xf32>
    %10 = tpu.matmul %7, %9, %cst_11 {dimension_numbers = #tpu.dot_dimension_numbers<[1], [0], [0], [1], [0, 0, 1, 1], [], []>} : vector<16x64xbf16>, vector<64x64xbf16>, vector<16x64xf32> -> vector<16x64xf32>
    %c1_12 = arith.constant 1 : index
    %c0_13 = arith.constant 0 : index
    %11 = vector.load %arg9[%c1_12, %c0_13] : memref<18x64xf32, #tpu.memory_space<vmem>>, vector<16x64xf32>
    %12 = arith.truncf %11 : vector<16x64xf32> to vector<16x64xbf16>
    %c1_14 = arith.constant 1 : index
    %c0_15 = arith.constant 0 : index
    %c0_16 = arith.constant 0 : index
    %13 = vector.load %arg2[%c1_14, %c0_15, %c0_16] : memref<3x64x64xbf16, #tpu.memory_space<vmem>>, vector<1x64x64xbf16>
    %14 = vector.shape_cast %13 : vector<1x64x64xbf16> to vector<64x64xbf16>
    %cst_17 = arith.constant dense<0.000000e+00> : vector<16x64xf32>
    %15 = tpu.matmul %12, %14, %cst_17 {dimension_numbers = #tpu.dot_dimension_numbers<[1], [0], [0], [1], [0, 0, 1, 1], [], []>} : vector<16x64xbf16>, vector<64x64xbf16>, vector<16x64xf32> -> vector<16x64xf32>
    %16 = arith.addf %10, %15 : vector<16x64xf32>
    %c2 = arith.constant 2 : index
    %c0_18 = arith.constant 0 : index
    %17 = vector.load %arg9[%c2, %c0_18] : memref<18x64xf32, #tpu.memory_space<vmem>>, vector<16x64xf32>
    %18 = arith.truncf %17 : vector<16x64xf32> to vector<16x64xbf16>
    %c2_19 = arith.constant 2 : index
    %c0_20 = arith.constant 0 : index
    %c0_21 = arith.constant 0 : index
    %19 = vector.load %arg2[%c2_19, %c0_20, %c0_21] : memref<3x64x64xbf16, #tpu.memory_space<vmem>>, vector<1x64x64xbf16>
    %20 = vector.shape_cast %19 : vector<1x64x64xbf16> to vector<64x64xbf16>
    %cst_22 = arith.constant dense<0.000000e+00> : vector<16x64xf32>
    %21 = tpu.matmul %18, %20, %cst_22 {dimension_numbers = #tpu.dot_dimension_numbers<[1], [0], [0], [1], [0, 0, 1, 1], [], []>} : vector<16x64xbf16>, vector<64x64xbf16>, vector<16x64xf32> -> vector<16x64xf32>
    %22 = arith.addf %16, %21 : vector<16x64xf32>
    %c0_23 = arith.constant 0 : index
    %c0_24 = arith.constant 0 : index
    %23 = vector.load %arg3[%c0_23, %c0_24] : memref<1x64xf32, #tpu.memory_space<vmem>>, vector<1x64xf32>
    %24 = vector.broadcast %23 : vector<1x64xf32> to vector<16x64xf32>
    %25 = arith.mulf %22, %24 : vector<16x64xf32>
    %c0_25 = arith.constant 0 : index
    %c0_26 = arith.constant 0 : index
    %26 = vector.load %arg4[%c0_25, %c0_26] : memref<1x64xf32, #tpu.memory_space<vmem>>, vector<1x64xf32>
    %27 = vector.broadcast %26 : vector<1x64xf32> to vector<16x64xf32>
    %28 = arith.addf %25, %27 : vector<16x64xf32>
    %cst_27 = arith.constant 0.000000e+00 : f32
    %29 = vector.broadcast %cst_27 : f32 to vector<16x64xf32>
    %30 = arith.maximumf %28, %29 : vector<16x64xf32>
    %c1_28 = arith.constant 1 : index
    %c0_29 = arith.constant 0 : index
    %31 = vector.load %arg9[%c1_28, %c0_29] : memref<18x64xf32, #tpu.memory_space<vmem>>, vector<16x64xf32>
    tpu.vector_store %arg9[%c1_28, %c0_29], %30 {strides = array<i32>} : memref<18x64xf32, #tpu.memory_space<vmem>>, vector<16x64xf32>,
    %c0_30 = arith.constant 0 : index
    %c0_31 = arith.constant 0 : index
    %32 = vector.load %arg9[%c0_30, %c0_31] : memref<18x64xf32, #tpu.memory_space<vmem>>, vector<16x64xf32>
    %33 = arith.truncf %32 : vector<16x64xf32> to vector<16x64xbf16>
    %c0_32 = arith.constant 0 : index
    %c0_33 = arith.constant 0 : index
    %c0_34 = arith.constant 0 : index
    %34 = vector.load %arg5[%c0_32, %c0_33, %c0_34] : memref<3x64x64xbf16, #tpu.memory_space<vmem>>, vector<1x64x64xbf16>
    %35 = vector.shape_cast %34 : vector<1x64x64xbf16> to vector<64x64xbf16>
    %cst_35 = arith.constant dense<0.000000e+00> : vector<16x64xf32>
    %36 = tpu.matmul %33, %35, %cst_35 {dimension_numbers = #tpu.dot_dimension_numbers<[1], [0], [0], [1], [0, 0, 1, 1], [], []>} : vector<16x64xbf16>, vector<64x64xbf16>, vector<16x64xf32> -> vector<16x64xf32>
    %c1_36 = arith.constant 1 : index
    %c0_37 = arith.constant 0 : index
    %37 = vector.load %arg9[%c1_36, %c0_37] : memref<18x64xf32, #tpu.memory_space<vmem>>, vector<16x64xf32>
    %38 = arith.truncf %37 : vector<16x64xf32> to vector<16x64xbf16>
    %c1_38 = arith.constant 1 : index
    %c0_39 = arith.constant 0 : index
    %c0_40 = arith.constant 0 : index
    %39 = vector.load %arg5[%c1_38, %c0_39, %c0_40] : memref<3x64x64xbf16, #tpu.memory_space<vmem>>, vector<1x64x64xbf16>
    %40 = vector.shape_cast %39 : vector<1x64x64xbf16> to vector<64x64xbf16>
    %cst_41 = arith.constant dense<0.000000e+00> : vector<16x64xf32>
    %41 = tpu.matmul %38, %40, %cst_41 {dimension_numbers = #tpu.dot_dimension_numbers<[1], [0], [0], [1], [0, 0, 1, 1], [], []>} : vector<16x64xbf16>, vector<64x64xbf16>, vector<16x64xf32> -> vector<16x64xf32>
    %42 = arith.addf %36, %41 : vector<16x64xf32>
    %c2_42 = arith.constant 2 : index
    %c0_43 = arith.constant 0 : index
    %43 = vector.load %arg9[%c2_42, %c0_43] : memref<18x64xf32, #tpu.memory_space<vmem>>, vector<16x64xf32>
    %44 = arith.truncf %43 : vector<16x64xf32> to vector<16x64xbf16>
    %c2_44 = arith.constant 2 : index
    %c0_45 = arith.constant 0 : index
    %c0_46 = arith.constant 0 : index
    %45 = vector.load %arg5[%c2_44, %c0_45, %c0_46] : memref<3x64x64xbf16, #tpu.memory_space<vmem>>, vector<1x64x64xbf16>
    %46 = vector.shape_cast %45 : vector<1x64x64xbf16> to vector<64x64xbf16>
    %cst_47 = arith.constant dense<0.000000e+00> : vector<16x64xf32>
    %47 = tpu.matmul %44, %46, %cst_47 {dimension_numbers = #tpu.dot_dimension_numbers<[1], [0], [0], [1], [0, 0, 1, 1], [], []>} : vector<16x64xbf16>, vector<64x64xbf16>, vector<16x64xf32> -> vector<16x64xf32>
    %48 = arith.addf %42, %47 : vector<16x64xf32>
    %c0_48 = arith.constant 0 : index
    %c0_49 = arith.constant 0 : index
    %49 = vector.load %arg6[%c0_48, %c0_49] : memref<1x64xf32, #tpu.memory_space<vmem>>, vector<1x64xf32>
    %50 = vector.broadcast %49 : vector<1x64xf32> to vector<16x64xf32>
    %51 = arith.mulf %48, %50 : vector<16x64xf32>
    %c0_50 = arith.constant 0 : index
    %c0_51 = arith.constant 0 : index
    %52 = vector.load %arg7[%c0_50, %c0_51] : memref<1x64xf32, #tpu.memory_space<vmem>>, vector<1x64xf32>
    %53 = vector.broadcast %52 : vector<1x64xf32> to vector<16x64xf32>
    %54 = arith.addf %51, %53 : vector<16x64xf32>
    %55 = arith.addf %54, %4 : vector<16x64xf32>
    %cst_52 = arith.constant 0.000000e+00 : f32
    %56 = vector.broadcast %cst_52 : f32 to vector<16x64xf32>
    %57 = arith.maximumf %55, %56 : vector<16x64xf32>
    %c0_53 = arith.constant 0 : index
    %c0_54 = arith.constant 0 : index
    %c0_55 = arith.constant 0 : index
    %58 = vector.load %arg8[%c0_53, %c0_54, %c0_55] : memref<1x16x64xf32, #tpu.memory_space<vmem>>, vector<1x16x64xf32>
    %59 = vector.shape_cast %58 : vector<1x16x64xf32> to vector<16x64xf32>
    %60 = vector.shape_cast %57 : vector<16x64xf32> to vector<1x16x64xf32>
    tpu.vector_store %arg8[%c0_53, %c0_54, %c0_55], %60 {strides = array<i32>} : memref<1x16x64xf32, #tpu.memory_space<vmem>>, vector<1x16x64xf32>,
    return
  }
  func.func @transform_0(%arg0: i32) -> (i32, i32, i32) {
    %c0_i32 = arith.constant 0 : i32
    %c0_i32_0 = arith.constant 0 : i32
    %c0_i32_1 = arith.constant 0 : i32
    return %arg0, %c0_i32, %c0_i32_0 : i32, i32, i32
  }
  func.func @transform_1(%arg0: i32) -> (i32, i32, i32) {
    %c0_i32 = arith.constant 0 : i32
    %c0_i32_0 = arith.constant 0 : i32
    %c0_i32_1 = arith.constant 0 : i32
    %c0_i32_2 = arith.constant 0 : i32
    return %c0_i32, %c0_i32_0, %c0_i32_1 : i32, i32, i32
  }
  func.func @transform_2(%arg0: i32) -> (i32, i32) {
    %c0_i32 = arith.constant 0 : i32
    %c0_i32_0 = arith.constant 0 : i32
    %c0_i32_1 = arith.constant 0 : i32
    return %c0_i32, %c0_i32_0 : i32, i32
  }
  func.func @transform_3(%arg0: i32) -> (i32, i32) {
    %c0_i32 = arith.constant 0 : i32
    %c0_i32_0 = arith.constant 0 : i32
    %c0_i32_1 = arith.constant 0 : i32
    return %c0_i32, %c0_i32_0 : i32, i32
  }
  func.func @transform_4(%arg0: i32) -> (i32, i32, i32) {
    %c0_i32 = arith.constant 0 : i32
    %c0_i32_0 = arith.constant 0 : i32
    %c0_i32_1 = arith.constant 0 : i32
    %c0_i32_2 = arith.constant 0 : i32
    return %c0_i32, %c0_i32_0, %c0_i32_1 : i32, i32, i32
  }
  func.func @transform_5(%arg0: i32) -> (i32, i32) {
    %c0_i32 = arith.constant 0 : i32
    %c0_i32_0 = arith.constant 0 : i32
    %c0_i32_1 = arith.constant 0 : i32
    return %c0_i32, %c0_i32_0 : i32, i32
  }
  func.func @transform_6(%arg0: i32) -> (i32, i32) {
    %c0_i32 = arith.constant 0 : i32
    %c0_i32_0 = arith.constant 0 : i32
    %c0_i32_1 = arith.constant 0 : i32
    return %c0_i32, %c0_i32_0 : i32, i32
  }
  func.func @transform_7(%arg0: i32) -> (i32, i32, i32) {
    %c0_i32 = arith.constant 0 : i32
    %c0_i32_0 = arith.constant 0 : i32
    %c0_i32_1 = arith.constant 0 : i32
    return %arg0, %c0_i32, %c0_i32_0 : i32, i32, i32
  }
}

</mosaic_0001>

<bundles_post_ra>
// kernel: tile.23
= control target key start
LH: loop header
LB: loop body
LE: loop exit
PB: predicated region body
PF: predicated region fallthrough
CT: control target
= control target key end

     0   :  { %s28_s0 = inlined_call_operand.vmem [shape: f32[4], index: 0, kind: input, shape index: {}]   ;;  %s29_s1 = inlined_call_operand.vmem [shape: f32[16,4], index: 1, kind: output, shape index: {}]  }
   0x1   :  { %v4_v0 = vld [vmem:[%s28_s0] ss:$0 sm:$0xff] }
   0x2   :  { %5 = vst [vmem:[%s29_s1] sm:$0xff] %v4_v0  ;;  %8 = vst [vmem:[%s29_s1 + $0x8] sm:$0xff] %v4_v0 }

// kernel: tile.24
= control target key start
LH: loop header
LB: loop body
LE: loop exit
PB: predicated region body
PF: predicated region fallthrough
CT: control target
= control target key end

     0   :  { %s133_s10 = smov 60   ;;  %s134_s11 = smov 52   ;;  %vm3_vm0 = vcmask 31744   ;;  %vm9_vm1 = vcmask 523744   ;;  %vm15_vm2 = vcmask 490944   ;;  %vm21_vm3 = vcmask 458144   ;;  %s209_s0 = inlined_call_operand.vmem [shape: f32[16,4], index: 0, kind: input, shape index: {}]   ;;  %s210_s1 = inlined_call_operand.vmem [shape: f32[1,64], index: 1, kind: output, shape index: {}]  }
   0x1   :  { %v103_v0 = vld [vmem:[%s209_s0 + $0xf] sm:$0x1]   ;;  %v105_v1 = vld [vmem:[%s209_s0 + $0xd] sm:$0x1]   ;;  %v104_v2 = vld [vmem:[%s209_s0 + $0xe] sm:$0x1]  }
   0x2   :  { %7 = vrot.lane.b32.xlu0 %v103_v0, %s133_s10  ;;  %19 = vrot.lane.b32.xlu1 %v105_v1, %s134_s11  ;;  %v106_v3 = vld [vmem:[%s209_s0 + $0xc] sm:$0x1]   ;;  %s135_s16 = smov 56   ;;  %s136_s17 = smov 48   ;;  %v107_v4 = vld [vmem:[%s209_s0 + $0xb] sm:$0x1]  }
   0x3   :  { %v108_v5 = vld [vmem:[%s209_s0 + $0xa] sm:$0x1]   ;;  %v2_v6 = vld [vmem:[%s209_s0] sm:$0x1]   ;;  %s137_s24 = smov 44   ;;  %s138_s25 = smov 40  }
   0x4   :  { %4 = vst.msk [vmem:[#allocation0] sm:$0x1] %vm3_vm0, %v2_v6   ;;  %v109_v7 = vld [vmem:[%s209_s0 + $0x9] sm:$0x1]   ;;  %v110_v8 = vld [vmem:[%s209_s0 + $0x8] sm:$0x1]  }
   0x5   :  { %s139_s30 = smov 36   ;;  %s140_s2 = smov 32   ;;  %v111_v9 = vld [vmem:[%s209_s0 + $0x7] sm:$0x1]   ;;  %v112_v10 = vld [vmem:[%s209_s0 + $0x6] sm:$0x1]  }
   0x6   :  { %13 = vrot.lane.b32.xlu0 %v104_v2, %s135_s16  ;;  %25 = vrot.lane.b32.xlu1 %v106_v3, %s136_s17  ;;  %s141_s7 = smov 28   ;;  %s142_s8 = smov 24   ;;  %v113_v11 = vld [vmem:[%s209_s0 + $0x5] sm:$0x1]   ;;  %v114_v12 = vld [vmem:[%s209_s0 + $0x4] sm:$0x1]  }
   0x7   :  { %s143_s13 = smov 20   ;;  %s144_s14 = smov 16   ;;  %v115_v13 = vld [vmem:[%s209_s0 + $0x3] sm:$0x1]   ;;  %v116_v14 = vld [vmem:[%s209_s0 + $0x2] sm:$0x1]  }
   0x8   :  { %s145_s19 = smov 12   ;;  %s146_s20 = smov 8   ;;  %v117_v15 = vld [vmem:[%s209_s0 + $0x1] sm:$0x1]   ;;  %vm27_vm4 = vcmask 425344   ;;  %vm33_vm5 = vcmask 392544  }
   0x9   :  { %s147_s0 = smov 4   ;;  %vm39_vm6 = vcmask 359744   ;;  %vm45_vm7 = vcmask 326944   ;;  %vm51_vm8 = vcmask 294144   ;;  %vm57_vm9 = vcmask 261344  }
   0xa   :  { %31 = vrot.lane.b32.xlu0 %v107_v4, %s137_s24  ;;  %37 = vrot.lane.b32.xlu1 %v108_v5, %s138_s25  ;;  %vm63_vm10 = vcmask 228544   ;;  %vm69_vm11 = vcmask 195744   ;;  %vm75_vm12 = vcmask 162944   ;;  %vm81_vm13 = vcmask 130144  }
   0xb   :  { %vm87_vm14 = vcmask 97344   ;;  %vm93_vm15 = vcmask 64544  }
   0xe   :  { %43 = vrot.lane.b32.xlu0 %v109_v7, %s139_s30  ;;  %49 = vrot.lane.b32.xlu1 %v110_v8, %s140_s2 }
  0x12   :  { %55 = vrot.lane.b32.xlu0 %v111_v9, %s141_s7  ;;  %61 = vrot.lane.b32.xlu1 %v112_v10, %s142_s8 }
  0x16   :  { %67 = vrot.lane.b32.xlu0 %v113_v11, %s143_s13  ;;  %73 = vrot.lane.b32.xlu1 %v114_v12, %s144_s14 }
  0x1a   :  { %79 = vrot.lane.b32.xlu0 %v115_v13, %s145_s19  ;;  %85 = vrot.lane.b32.xlu1 %v116_v14, %s146_s20 }
  0x1e   :  { %91 = vrot.lane.b32.xlu0 %v117_v15, %s147_s0 }
  0x74   :  { %v8_v16 = vpop.permute.xlu0 %7   ;;  %v20_v17 = vpop.permute.xlu1 %19  }
  0x75   :  { %10 = vst.msk [vmem:[#allocation0] sm:$0x1] %vm9_vm1, %v8_v16  }
  0x78   :  { %v14_v18 = vpop.permute.xlu0 %13   ;;  %v26_v19 = vpop.permute.xlu1 %25  }
  0x79   :  { %16 = vst.msk [vmem:[#allocation0] sm:$0x1] %vm15_vm2, %v14_v18  }
  0x7a   :  { %22 = vst.msk [vmem:[#allocation0] sm:$0x1] %vm21_vm3, %v20_v17  }
  0x7b   :  { %28 = vst.msk [vmem:[#allocation0] sm:$0x1] %vm27_vm4, %v26_v19  }
  0x7c   :  { %v32_v20 = vpop.permute.xlu0 %31   ;;  %v38_v21 = vpop.permute.xlu1 %37  }
  0x7d   :  { %34 = vst.msk [vmem:[#allocation0] sm:$0x1] %vm33_vm5, %v32_v20  }
  0x7e   :  { %40 = vst.msk [vmem:[#allocation0] sm:$0x1] %vm39_vm6, %v38_v21  }
  0x80   :  { %v44_v22 = vpop.permute.xlu0 %43   ;;  %v50_v23 = vpop.permute.xlu1 %49  }
  0x81   :  { %46 = vst.msk [vmem:[#allocation0] sm:$0x1] %vm45_vm7, %v44_v22  }
  0x82   :  { %52 = vst.msk [vmem:[#allocation0] sm:$0x1] %vm51_vm8, %v50_v23  }
  0x84   :  { %v56_v24 = vpop.permute.xlu0 %55   ;;  %v62_v25 = vpop.permute.xlu1 %61  }
  0x85   :  { %58 = vst.msk [vmem:[#allocation0] sm:$0x1] %vm57_vm9, %v56_v24  }
  0x86   :  { %64 = vst.msk [vmem:[#allocation0] sm:$0x1] %vm63_vm10, %v62_v25  }
  0x88   :  { %v68_v26 = vpop.permute.xlu0 %67   ;;  %v74_v27 = vpop.permute.xlu1 %73  }
  0x89   :  { %70 = vst.msk [vmem:[#allocation0] sm:$0x1] %vm69_vm11, %v68_v26  }
  0x8a   :  { %76 = vst.msk [vmem:[#allocation0] sm:$0x1] %vm75_vm12, %v74_v27  }
  0x8c   :  { %v80_v28 = vpop.permute.xlu0 %79   ;;  %v86_v29 = vpop.permute.xlu1 %85  }
  0x8d   :  { %82 = vst.msk [vmem:[#allocation0] sm:$0x1] %vm81_vm13, %v80_v28  }
  0x8e   :  { %88 = vst.msk [vmem:[#allocation0] sm:$0x1] %vm87_vm14, %v86_v29  }
  0x90   :  { %v92_v30 = vpop.permute.xlu0 %91  }
  0x91   :  { %94 = vst.msk [vmem:[#allocation0] sm:$0x1] %vm93_vm15, %v92_v30  }
  0x98   :  { %v99_v31 = vld [vmem:[#allocation0] sm:$0x1] }
  0x99   :  { %102 = vst [vmem:[%s210_s1] sm:$0x1] %v99_v31 }

// kernel: basic_block_forward.1
= control target key start
LH: loop header
LB: loop body
LE: loop exit
PB: predicated region body
PF: predicated region fallthrough
CT: control target
= control target key end

     0   :  { %s1136_s24 = smov 0   ;;  %s1302_s0 = inlined_call_operand.vmem [shape: f32[2,16,64], index: 0, kind: input, shape index: {}]   ;;  %s1303_s1 = inlined_call_operand.vmem [shape: bf16[3,64,64], index: 1, kind: input, shape index: {}]   ;;  %s1304_s2 = inlined_call_operand.vmem [shape: f32[1,64], index: 2, kind: input, shape index: {}]   ;;  %s1305_s3 = inlined_call_operand.vmem [shape: f32[1,64], index: 3, kind: input, shape index: {}]   ;;  %s1306_s4 = inlined_call_operand.vmem [shape: bf16[3,64,64], index: 4, kind: input, shape index: {}]   ;;  %s1307_s5 = inlined_call_operand.vmem [shape: f32[1,64], index: 5, kind: input, shape index: {}]   ;;  %s1308_s6 = inlined_call_operand.vmem [shape: f32[1,64], index: 6, kind: input, shape index: {}]   ;;  %s1309_s7 = inlined_call_operand.vmem [shape: f32[2,16,64], index: 7, kind: output, shape index: {}]  }
   0x1 LB: > { %s871_s25 = sadd.s32 4294967295, %s1092_s24   ;;  %p875_p0 = scmp.ge.s32.totalorder %s1092_s24, 1  ;;  %s1092_s24 = sphi %s1136_s24, %s17_s24  }
   0x2   : > { %p237_p1 = scmp.lt.s32.totalorder %s1092_s24, 3 }
   0x4   : > { %p238_p2 = pnand %p875_p0, %p237_p1 }
   0x5   : > { %p269_p3 = scmp.lt.s32.totalorder (!%p238_p2), %s871_s25, 1 }
   0x6   : > { %241 = sbr.rel (%p238_p2) target bundleno = 483 (0x1e3), region = 48 }
   0xb   : > { %v1062_v0 = vld [vmem:[%s1303_s1 + $0x38] sm:$0xff]   ;;  %v1094_v1 = vmov 0.0   ;;  %v1064_v3 = vld [vmem:[%s1303_s1 + $0x30] sm:$0xff]   ;;  %vm1095_vm0 = vmmov 0   ;;  %s1311_s25 = smov (!%p269_p3, %s871_s25), 1  ;;  %vm285_vm1 = vcmask 523264  }
   0xc   : > { %980 = vmatprep.subr.bf16.mxu0 %v1094_v1  ;;  %992 = vmatprep.subr.bf16.mxu1 %v1094_v1  ;;  %v1063_v2 = vld [vmem:[%s1303_s1 + $0x18] sm:$0xff]   ;;  %v1065_v4 = vld [vmem:[%s1303_s1 + $0x10] sm:$0xff]   ;;  %vm280_vm2 = vcmask 516096   ;;  %v1066_v5 = vld [vmem:[%s1303_s1 + $0x28] sm:$0xff]   ;;  %s948_s13 = sshll.u32 %s1311_s25, 4 }
   0xd   : > { %981 = vmatpush3.bf16.msra.mxu0 %v1062_v0  ;;  %988 = vmatprep.mubr.msk.bf16.mxu0 %vm1095_vm0, %v1094_v1  ;;  %281 = vst.msk [vmem:[#allocation2] sm:$0x1] %vm280_vm2, %v1094_v1  ;;  %282 = vst.msk [vmem:[#allocation2 + $0x11] sm:$0x1] %vm280_vm2, %v1094_v1  ;;  %v1067_v6 = vld [vmem:[%s1303_s1 + $0x8] sm:$0xff]   ;;  %s273_s18 = scalar_lea.vmem %s1302_s0, %s948_s13  ;;  %v1068_v9 = vld [vmem:[%s1303_s1 + $0x20] sm:$0xff]   ;;  %s278_s27 = scalar_lea.vmem %s1309_s7, %s948_s13 }
   0xe   : > { %993 = vmatpush3.bf16.msra.mxu1 %v1063_v2  ;;  %982 = vmatprep.subr.bf16.mxu0 %v1094_v1  ;;  %v1182_v7 = vld [vmem:[%s273_s18] sm:$0xff]  ;;  %v1184_v8 = vld [vmem:[%s273_s18 + $0x8] sm:$0xff]  ;;  %v1070_v11 = vld [vmem:[%s1303_s1 + $0x58] sm:$0xff]  }
   0xf   : > { %994 = vmatprep.subr.bf16.mxu1 %v1094_v1  ;;  %1000 = vmatprep.mubr.msk.bf16.mxu1 %vm1095_vm0, %v1094_v1  ;;  %286 = vst.msk [vmem:[#allocation2 + $0x1] sm:$0xff] %vm285_vm1, %v1182_v7  ;;  %287 = vst.msk [vmem:[#allocation2 + $0x9] sm:$0xff] %vm285_vm1, %v1184_v8  ;;  %v1069_v10 = vld [vmem:[%s1303_s1] sm:$0xff]   ;;  %v1071_v18 = vld [vmem:[%s1303_s1 + $0x50] sm:$0xff]  }
  0x10   : > { %v1072_v19 = vld [vmem:[%s1303_s1 + $0x48] sm:$0xff]   ;;  %v1073_v20 = vld [vmem:[%s1303_s1 + $0x40] sm:$0xff]   ;;  %v1074_v24 = vld [vmem:[%s1306_s4 + $0x38] sm:$0xff]  }
  0x11   : > { %983 = vmatpush3.bf16.msra.mxu0 %v1064_v3  ;;  %v1075_v25 = vld [vmem:[%s1306_s4 + $0x18] sm:$0xff]   ;;  %v1076_v26 = vld [vmem:[%s1306_s4 + $0x30] sm:$0xff]   ;;  %v1078_v28 = vld [vmem:[%s1306_s4 + $0x28] sm:$0xff]  }
  0x12   : > { %995 = vmatpush3.bf16.msra.mxu1 %v1065_v4  ;;  %984 = vmatprep.subr.bf16.mxu0 %v1094_v1  ;;  %v1077_v27 = vld [vmem:[%s1306_s4 + $0x10] sm:$0xff]   ;;  %v1079_v29 = vld [vmem:[%s1306_s4 + $0x8] sm:$0xff]   ;;  %v1080_v30 = vld [vmem:[%s1306_s4 + $0x20] sm:$0xff]  }
  0x13   : > { %996 = vmatprep.subr.bf16.mxu1 %v1094_v1  ;;  %v1081_v31 = vld [vmem:[%s1306_s4] sm:$0xff]   ;;  %v1082_v57 = vld [vmem:[%s1306_s4 + $0x58] sm:$0xff]   ;;  %v1083_v63 = vld [vmem:[%s1306_s4 + $0x50] sm:$0xff]  }
  0x14   : > { %v911_v42 = vld [vmem:[%s1304_s2] ss:$0 sm:$0xff]  ;;  %v1084_v0 = vld [vmem:[%s1306_s4 + $0x48] sm:$0xff]  }
  0x15   : > { %985 = vmatpush3.bf16.msra.mxu0 %v1066_v5  ;;  %v912_v44 = vld [vmem:[%s1305_s3] ss:$0 sm:$0xff] }
  0x16   : > { %997 = vmatpush3.bf16.msra.mxu1 %v1067_v6  ;;  %986 = vmatprep.subr.bf16.mxu0 %v1094_v1  ;;  %v299_v12 = vld [vmem:[#allocation2 + $0x1] sm:$0xff]  ;;  %v300_v13 = vld [vmem:[#allocation2 + $0x9] sm:$0xff] }
  0x17   : > { %998 = vmatprep.subr.bf16.mxu1 %v1094_v1  ;;  %v288_v14 = vld [vmem:[#allocation2] sm:$0xff]  ;;  %v301_v15 = vpack.c.bf16 %v300_v13, %v299_v12  ;;  %v289_v16 = vld [vmem:[#allocation2 + $0x8] sm:$0xff] }
  0x18   : > { %v290_v17 = vpack.c.bf16 %v289_v16, %v288_v14  ;;  %v447_v21 = vld [vmem:[#allocation2 + $0x2] sm:$0xff]  ;;  %v448_v22 = vld [vmem:[#allocation2 + $0xa] sm:$0xff] }
  0x19   : > { %987 = vmatpush3.bf16.msra.mxu0 %v1068_v9  ;;  %v449_v23 = vpack.c.bf16 %v448_v22, %v447_v21  ;;  %v1085_v2 = vld [vmem:[%s1306_s4 + $0x40] sm:$0xff]  }
  0x1a   : > { %999 = vmatpush3.bf16.msra.mxu1 %v1069_v10  ;;  %1004 = vmatprep.subr.bf16.mxu0 %v1094_v1 }
  0x1b   : > { %1016 = vmatprep.subr.bf16.mxu1 %v1094_v1 }
  0x1c   : > { %989 = vmatmul.mubr.msk.bf16.vlgmr.msra.gmra.mxu0 %vm285_vm1, %v301_v15 }
  0x1d   : > { %1001 = vmatmul.mubr.msk.bf16.vlgmr.msra.gmra.mxu1 %vm285_vm1, %v290_v17  ;;  %1005 = vmatpush3.bf16.msra.mxu0 %v1070_v11 }
  0x1e   : > { %1006 = vmatprep.subr.bf16.mxu0 %v1094_v1  ;;  %1012 = vmatprep.mubr.msk.bf16.mxu0 %vm1095_vm0, %v1094_v1 }
  0x1f   : > { %1024 = vmatprep.mubr.msk.bf16.mxu1 %vm1095_vm0, %v1094_v1  ;;  %1017 = vmatpush3.bf16.msra.mxu1 %v1074_v24 }
  0x20   : > { %1018 = vmatprep.subr.bf16.mxu1 %v1094_v1 }
  0x21   : > { %1007 = vmatpush3.bf16.msra.mxu0 %v1071_v18 }
  0x22   : > { %1008 = vmatprep.subr.bf16.mxu0 %v1094_v1 }
  0x23   : > { %1019 = vmatpush3.bf16.msra.mxu1 %v1076_v26 }
  0x24   : > { %1020 = vmatprep.subr.bf16.mxu1 %v1094_v1 }
  0x25   : > { %1009 = vmatpush3.bf16.msra.mxu0 %v1072_v19  ;;  %v945_v19 = vld [vmem:[%s1308_s6] ss:$0 sm:$0xff] }
  0x26   : > { %1010 = vmatprep.subr.bf16.mxu0 %v1094_v1 }
  0x27   : > { %1021 = vmatpush3.bf16.msra.mxu1 %v1078_v28 }
  0x28   : > { %1022 = vmatprep.subr.bf16.mxu1 %v1094_v1 }
  0x29   : > { %1011 = vmatpush3.bf16.msra.mxu0 %v1073_v20 }
  0x2a   : > { %1028 = vmatprep.subr.bf16.mxu0 %v1094_v1 }
  0x2b   : > { %1023 = vmatpush3.bf16.msra.mxu1 %v1080_v30 }
  0x2c   : > { %1013 = vmatmul.mubr.msk.bf16.vlgmr.msra.gmra.mxu0 %vm285_vm1, %v449_v23  ;;  %1040 = vmatprep.subr.bf16.mxu1 %v1094_v1 }
  0x2d   : > { %1036 = vmatprep.mubr.msk.bf16.mxu0 %vm1095_vm0, %v1094_v1  ;;  %1029 = vmatpush3.bf16.msra.mxu0 %v1075_v25 }
  0x2e   : > { %1030 = vmatprep.subr.bf16.mxu0 %v1094_v1 }
  0x31   : > { %1031 = vmatpush3.bf16.msra.mxu0 %v1077_v27 }
  0x32   : > { %1032 = vmatprep.subr.bf16.mxu0 %v1094_v1 }
  0x35   : > { %1033 = vmatpush3.bf16.msra.mxu0 %v1079_v29 }
  0x36   : > { %1034 = vmatprep.subr.bf16.mxu0 %v1094_v1 }
  0x39   : > { %1035 = vmatpush3.bf16.msra.mxu0 %v1081_v31 }
  0xdc   : > { %v372_v32 = vpop.f32.mrf.mxu0 }
  0xdd   : > { %v440_v33 = vpop.f32.mrf.mxu1 }
  0xde   : > { %v990_v34 = vpop.f32.mrf.mxu0  ;;  %v441_v40 = vadd.f32 %v440_v33, %v372_v32 }
  0xdf   : > { %v1002_v35 = vpop.f32.mrf.mxu1 }
  0xe0   : > { %v375_v36 = vpop.f32.mrf.mxu0 }
  0xe1   : > { %v443_v37 = vpop.f32.mrf.mxu1 }
  0xe2   : > { %v991_v38 = vpop.f32.mrf.mxu0  ;;  %v444_v46 = vadd.f32 %v443_v37, %v375_v36 }
  0xe3   : > { %v1003_v39 = vpop.f32.mrf.mxu1 }
  0xec   : > { %v520_v41 = vpop.f32.mrf.mxu0 }
  0xed   : > { %v527_v43 = vadd.f32 %v520_v41, %v441_v40 }
  0xee   : > { %v1014_v45 = vpop.f32.mrf.mxu0 }
  0xef   : > { %v536_v47 = vmul.f32 %v911_v42, %v527_v43 }
  0xf0   : > { %v523_v48 = vpop.f32.mrf.mxu0 }
  0xf1   : > { %v545_v49 = vadd.f32 %v912_v44, %v536_v47  ;;  %v528_v50 = vadd.f32 %v523_v48, %v444_v46 }
  0xf2   : > { %v1015_v51 = vpop.f32.mrf.mxu0 }
  0xf3   : > { %v547_v52 = vmax.f32 %v545_v49, 0.0  ;;  %v537_v53 = vmul.f32 %v911_v42, %v528_v50 }
  0xf5   : > { %549 = vst.msk [vmem:[#allocation2 + $0x1] sm:$0xff] %vm285_vm1, %v547_v52  ;;  %v546_v54 = vadd.f32 %v912_v44, %v537_v53 }
  0xf7   : > { %v548_v55 = vmax.f32 %v546_v54, 0.0 }
  0xf9   : > { %550 = vst.msk [vmem:[#allocation2 + $0x9] sm:$0xff] %vm285_vm1, %v548_v55 }
  0xfc   : > { %v562_v56 = vld [vmem:[#allocation2 + $0x1] sm:$0xff] }
  0xfd   : > { %v551_v59 = vld [vmem:[#allocation2] sm:$0xff] }
 0x100   : > { %v563_v58 = vld [vmem:[#allocation2 + $0x9] sm:$0xff] }
 0x101   : > { %v552_v60 = vld [vmem:[#allocation2 + $0x8] sm:$0xff]  ;;  %v564_v61 = vpack.c.bf16 %v563_v58, %v562_v56 }
 0x102   : > { %v553_v62 = vpack.c.bf16 %v552_v60, %v551_v59  ;;  %v710_v3 = vld [vmem:[#allocation2 + $0x2] sm:$0xff]  ;;  %v711_v4 = vld [vmem:[#allocation2 + $0xa] sm:$0xff] }
 0x103   : > { %1025 = vmatmul.mubr.msk.bf16.vlgmr.msra.gmra.mxu1 %vm285_vm1, %v564_v61  ;;  %v712_v5 = vpack.c.bf16 %v711_v4, %v710_v3 }
 0x104   : > { %1037 = vmatmul.mubr.msk.bf16.vlgmr.msra.gmra.mxu0 %vm285_vm1, %v553_v62  ;;  %1041 = vmatpush3.bf16.msra.mxu1 %v1082_v57 }
 0x105   : > { %1048 = vmatprep.mubr.msk.bf16.mxu1 %vm1095_vm0, %v1094_v1  ;;  %1042 = vmatprep.subr.bf16.mxu1 %v1094_v1 }
 0x108   : > { %1043 = vmatpush3.bf16.msra.mxu1 %v1083_v63 }
 0x109   : > { %1044 = vmatprep.subr.bf16.mxu1 %v1094_v1 }
 0x10c   : > { %1045 = vmatpush3.bf16.msra.mxu1 %v1084_v0 }
 0x10d   : > { %1046 = vmatprep.subr.bf16.mxu1 %v1094_v1  ;;  %v944_v1 = vld [vmem:[%s1307_s5] ss:$0 sm:$0xff] }
 0x110   : > { %1047 = vmatpush3.bf16.msra.mxu1 %v1085_v2 }
 0x113   : > { %1049 = vmatmul.mubr.msk.bf16.vlgmr.msra.gmra.mxu1 %vm285_vm1, %v712_v5 }
 0x1c3   : > { %v635_v6 = vpop.f32.mrf.mxu1 }
 0x1c4   : > { %v703_v9 = vpop.f32.mrf.mxu0 }
 0x1c5   : > { %v1026_v10 = vpop.f32.mrf.mxu1  ;;  %v704_v16 = vadd.f32 %v703_v9, %v635_v6 }
 0x1c6   : > { %v1038_v11 = vpop.f32.mrf.mxu0 }
 0x1c7   : > { %v638_v12 = vpop.f32.mrf.mxu1 }
 0x1c8   : > { %v706_v13 = vpop.f32.mrf.mxu0 }
 0x1c9   : > { %v1027_v14 = vpop.f32.mrf.mxu1  ;;  %v707_v21 = vadd.f32 %v706_v13, %v638_v12 }
 0x1ca   : > { %v1039_v15 = vpop.f32.mrf.mxu0 }
 0x1d3   : > { %v783_v17 = vpop.f32.mrf.mxu1 }
 0x1d4   : > { %v790_v18 = vadd.f32 %v783_v17, %v704_v16 }
 0x1d5   : > { %v1050_v20 = vpop.f32.mrf.mxu1 }
 0x1d6   : > { %v799_v22 = vmul.f32 %v944_v1, %v790_v18 }
 0x1d7   : > { %v786_v23 = vpop.f32.mrf.mxu1 }
 0x1d8   : > { %v808_v24 = vadd.f32 %v945_v19, %v799_v22  ;;  %v791_v25 = vadd.f32 %v786_v23, %v707_v21 }
 0x1d9   : > { %v1051_v26 = vpop.f32.mrf.mxu1 }
 0x1da   : > { %v810_v27 = vadd.f32 %v808_v24, %v1182_v7  ;;  %v800_v28 = vmul.f32 %v944_v1, %v791_v25 }
 0x1dc   : > { %v812_v29 = vmax.f32 %v810_v27, 0.0  ;;  %v809_v30 = vadd.f32 %v945_v19, %v800_v28 }
 0x1de   : > { %814 = vst.msk [vmem:[%s278_s27] sm:$0xff] %vm285_vm1, %v812_v29  ;;  %v811_v31 = vadd.f32 %v809_v30, %v1184_v8 }
 0x1e0   : > { %v813_v32 = vmax.f32 %v811_v31, 0.0 }
 0x1e2   : > { %815 = vst.msk [vmem:[%s278_s27 + $0x8] sm:$0xff] %vm285_vm1, %v813_v32 }
 0x1e3 PF: > { %s17_s24 = sadd.s32 1, %s1092_s24  }
 0x1e4   : > { %p14_p4 = scmp.ge.s32.totalorder %s17_s24, 4  }
 0x1e6   :  { %16 = sbr.rel (!%p14_p4) target bundleno = 1 (0x1), region = 82 }

</bundles_post_ra>
